<compile_context>
chip_gen: v5e
topology: v5e:2x2
jax: 0.10.0
libtpu: 0.0.40
codegen_flags: <defaults>
</compile_context>

<pallas_src>
import numpy as np
import jax
import jax.numpy as jnp
from jax import lax
from jax.experimental import pallas as pl
from jax.experimental.pallas import tpu as pltpu

VOCAB_SIZE = 256
SEED = 0
BIAS_FACTOR = 2.0
TOP_P = 0.9


def generate_green(vocab_size, seed):
    # identical to the PyTorch reference (deterministic, no file loads)
    rng = np.random.default_rng(seed)
    return rng.integers(low=0, high=2, size=vocab_size)


# ---------- single kernel: softmax + top-p filter + sample + score rewrite ----------
def unigram_topp_kernel(sl_ref, order_ref, u_ref, out_ref):
    sl = sl_ref[...]                      # (B, V) biased logits, sorted descending
    order = order_ref[...]                # (B, V) original vocab index of each slot
    B, V = sl.shape

    # softmax over the (sorted) row — same values as softmax-then-sort
    m = jnp.max(sl, axis=-1, keepdims=True)
    e = jnp.exp(sl - m)
    z = jnp.sum(e, axis=-1, keepdims=True)
    sp = e * pl.reciprocal(z, approx=True)            # sorted probs, descending

    pos = lax.broadcasted_iota(jnp.int32, (B, V), 1)

    # inclusive cumsum along the vocab (lane) axis: Hillis–Steele scan,
    # log2(V) XLU rolls + masked VPU adds (replaces the V*V tri-ones matmul).
    cum = sp
    shift = 1
    while shift < V:                                   # V is static -> unrolled
        rolled = pltpu.roll(cum, shift, 1)             # rolled[i] = cum[i - shift]
        cum = cum + jnp.where(pos >= shift, rolled, 0.0)
        shift *= 2

    # cutoff = searchsorted(cum, TOP_P, right=False) == count(cum < TOP_P)
    cutoff = jnp.sum((cum < TOP_P).astype(jnp.int32), axis=-1, keepdims=True)
    cutoff = jnp.minimum(cutoff, V - 1)
    keep = pos <= cutoff

    # mass kept by the top-p filter (== cum[cutoff]); guard replaces isfinite fixup
    total = jnp.sum(jnp.where(keep, sp, 0.0), axis=-1, keepdims=True)
    total = jnp.maximum(total, 1e-30)

    # inverse-CDF sample on the renormalized kept probs:
    #   cumsum(kept)/total < u   <=>   cum < u * total   (restricted to kept slots)
    thr = u_ref[...] * total                           # (B, 1)
    nxt = jnp.sum((keep & (cum < thr)).astype(jnp.int32), axis=-1, keepdims=True)
    nxt = jnp.minimum(nxt, cutoff)                     # never pick a filtered-out slot

    # token = order[nxt]   (one-hot gather, stays on the VPU)
    token = jnp.sum(jnp.where(pos == nxt, order, 0), axis=-1, keepdims=True)

    # scores[b, :] = 1e-5 ; scores[b, token] = 1e5
    out_ref[...] = jnp.where(pos == token, 1e5, 1e-5).astype(out_ref.dtype)


class UnigramProcessorPallas:
    def __init__(self, generation_config):
        v = generation_config["vocab_size"]
        green = generate_green(v, generation_config["seed"]).astype(np.float32)
        # precompute 2*green once (no per-call vmul)
        self.green_bias = jnp.asarray(BIAS_FACTOR * green)[None, :]   # (1, V)
        self._fn = jax.jit(self._forward)

    def _forward(self, scores, sample_key):
        B, V = scores.shape
        logits = scores + self.green_bias
        # TODO(synk): descending sort has no Pallas TPU primitive; one
        # lax.sort_key_val pass (keys + payload together) in host JAX.
        iota = lax.broadcasted_iota(jnp.int32, (B, V), 1)
        neg_sorted, order = lax.sort_key_val(-logits, iota, dimension=-1)
        sorted_logits = -neg_sorted
        # one uniform per row (replaces torch.multinomial's RNG stream)
        u = jax.random.uniform(sample_key, (B, 1), dtype=jnp.float32)

        vmem = pl.BlockSpec(memory_space=pltpu.MemorySpace.VMEM)
        # B is tiny (2 rows -> one (8,128)-padded block). For large B, add a
        # batch grid with dimension_semantics=("parallel",) so v7x's second
        # TensorCore takes half the rows.
        return pl.pallas_call(
            unigram_topp_kernel,
            out_shape=jax.ShapeDtypeStruct((B, V), jnp.float32),
            in_specs=[vmem, vmem, vmem],
            out_specs=vmem,
        )(sorted_logits, order, u)

    def __call__(self, input_ids, scores, sample_key):
        del input_ids  # only the batch size was used in the reference
        return self._fn(scores.astype(jnp.float32), sample_key)


if __name__ == "__main__":
    key = jax.random.PRNGKey(0)
    k_ids, k_scores, k_sample = jax.random.split(key, 3)

    B, V, S = 2, VOCAB_SIZE, 8
    cfg = {"vocab_size": V, "seed": SEED}
    proc = UnigramProcessorPallas(cfg)

    input_ids = jax.random.randint(k_ids, (B, S), 0, V, dtype=jnp.int32)
    scores = jax.random.normal(k_scores, (B, V), dtype=jnp.float32)

    out = proc(input_ids, scores, k_sample)
    out = jax.block_until_ready(out)

    assert out.shape == (B, V) and out.dtype == jnp.float32
    # each row must be 1e-5 everywhere except exactly one selected token at 1e5
    assert bool(jnp.all(jnp.sum(out == 1e5, axis=-1) == 1))
    assert bool(jnp.all(jnp.sum(out == 1e-5, axis=-1) == V - 1))

    print("KERNEL_OK")
</pallas_src>

<mosaic_0001>
module attributes {stable_mosaic.version = 11 : i64} {
  func.func @unigram_topp_kernel(%arg0: memref<2x256xf32, #tpu.memory_space<vmem>>, %arg1: memref<2x256xi32, #tpu.memory_space<vmem>>, %arg2: memref<2x1xf32, #tpu.memory_space<vmem>>, %arg3: memref<2x256xf32, #tpu.memory_space<vmem>>) attributes {dimension_semantics = [], scalar_prefetch = 0 : i64, scratch_operands = 0 : i64, tpu.core_type = #tpu.core_type<tc>} {
    %c0 = arith.constant 0 : index
    %c0_0 = arith.constant 0 : index
    %0 = vector.load %arg0[%c0, %c0_0] : memref<2x256xf32, #tpu.memory_space<vmem>>, vector<2x256xf32>
    %c0_1 = arith.constant 0 : index
    %c0_2 = arith.constant 0 : index
    %1 = vector.load %arg1[%c0_1, %c0_2] : memref<2x256xi32, #tpu.memory_space<vmem>>, vector<2x256xi32>
    %cst = arith.constant dense<0xFF800000> : vector<2xf32>
    %2 = vector.multi_reduction <maximumf>, %0, %cst [1] : vector<2x256xf32> to vector<2xf32>
    %3 = vector.shape_cast %2 : vector<2xf32> to vector<2x1xf32>
    %4 = vector.broadcast %3 : vector<2x1xf32> to vector<2x256xf32>
    %5 = arith.subf %0, %4 : vector<2x256xf32>
    %6 = math.exp %5 : vector<2x256xf32>
    %cst_3 = arith.constant dense<0.000000e+00> : vector<2xf32>
    %7 = vector.multi_reduction <add>, %6, %cst_3 [1] : vector<2x256xf32> to vector<2xf32>
    %8 = vector.shape_cast %7 : vector<2xf32> to vector<2x1xf32>
    %9 = tpu.reciprocal %8 {approx = true} : vector<2x1xf32> -> vector<2x1xf32>
    %10 = vector.broadcast %9 : vector<2x1xf32> to vector<2x256xf32>
    %11 = arith.mulf %6, %10 : vector<2x256xf32>
    %12 = tpu.iota {dimensions = array<i32: 1>} : vector<2x256xi32>
    %c1_i32 = arith.constant 1 : i32
    %13 = tpu.dynamic_rotate %11 by %c1_i32 dim 1 : vector<2x256xf32>, i32 -> vector<2x256xf32>
    %c1_i32_4 = arith.constant 1 : i32
    %14 = vector.broadcast %c1_i32_4 : i32 to vector<2x256xi32>
    %15 = arith.cmpi sge, %12, %14 : vector<2x256xi32>
    %cst_5 = arith.constant 0.000000e+00 : f32
    %16 = vector.broadcast %cst_5 : f32 to vector<2x256xf32>
    %17 = arith.select %15, %13, %16 : vector<2x256xi1>, vector<2x256xf32>
    %18 = arith.addf %11, %17 : vector<2x256xf32>
    %c2_i32 = arith.constant 2 : i32
    %19 = tpu.dynamic_rotate %18 by %c2_i32 dim 1 : vector<2x256xf32>, i32 -> vector<2x256xf32>
    %c2_i32_6 = arith.constant 2 : i32
    %20 = vector.broadcast %c2_i32_6 : i32 to vector<2x256xi32>
    %21 = arith.cmpi sge, %12, %20 : vector<2x256xi32>
    %cst_7 = arith.constant 0.000000e+00 : f32
    %22 = vector.broadcast %cst_7 : f32 to vector<2x256xf32>
    %23 = arith.select %21, %19, %22 : vector<2x256xi1>, vector<2x256xf32>
    %24 = arith.addf %18, %23 : vector<2x256xf32>
    %c4_i32 = arith.constant 4 : i32
    %25 = tpu.dynamic_rotate %24 by %c4_i32 dim 1 : vector<2x256xf32>, i32 -> vector<2x256xf32>
    %c4_i32_8 = arith.constant 4 : i32
    %26 = vector.broadcast %c4_i32_8 : i32 to vector<2x256xi32>
    %27 = arith.cmpi sge, %12, %26 : vector<2x256xi32>
    %cst_9 = arith.constant 0.000000e+00 : f32
    %28 = vector.broadcast %cst_9 : f32 to vector<2x256xf32>
    %29 = arith.select %27, %25, %28 : vector<2x256xi1>, vector<2x256xf32>
    %30 = arith.addf %24, %29 : vector<2x256xf32>
    %c8_i32 = arith.constant 8 : i32
    %31 = tpu.dynamic_rotate %30 by %c8_i32 dim 1 : vector<2x256xf32>, i32 -> vector<2x256xf32>
    %c8_i32_10 = arith.constant 8 : i32
    %32 = vector.broadcast %c8_i32_10 : i32 to vector<2x256xi32>
    %33 = arith.cmpi sge, %12, %32 : vector<2x256xi32>
    %cst_11 = arith.constant 0.000000e+00 : f32
    %34 = vector.broadcast %cst_11 : f32 to vector<2x256xf32>
    %35 = arith.select %33, %31, %34 : vector<2x256xi1>, vector<2x256xf32>
    %36 = arith.addf %30, %35 : vector<2x256xf32>
    %c16_i32 = arith.constant 16 : i32
    %37 = tpu.dynamic_rotate %36 by %c16_i32 dim 1 : vector<2x256xf32>, i32 -> vector<2x256xf32>
    %c16_i32_12 = arith.constant 16 : i32
    %38 = vector.broadcast %c16_i32_12 : i32 to vector<2x256xi32>
    %39 = arith.cmpi sge, %12, %38 : vector<2x256xi32>
    %cst_13 = arith.constant 0.000000e+00 : f32
    %40 = vector.broadcast %cst_13 : f32 to vector<2x256xf32>
    %41 = arith.select %39, %37, %40 : vector<2x256xi1>, vector<2x256xf32>
    %42 = arith.addf %36, %41 : vector<2x256xf32>
    %c32_i32 = arith.constant 32 : i32
    %43 = tpu.dynamic_rotate %42 by %c32_i32 dim 1 : vector<2x256xf32>, i32 -> vector<2x256xf32>
    %c32_i32_14 = arith.constant 32 : i32
    %44 = vector.broadcast %c32_i32_14 : i32 to vector<2x256xi32>
    %45 = arith.cmpi sge, %12, %44 : vector<2x256xi32>
    %cst_15 = arith.constant 0.000000e+00 : f32
    %46 = vector.broadcast %cst_15 : f32 to vector<2x256xf32>
    %47 = arith.select %45, %43, %46 : vector<2x256xi1>, vector<2x256xf32>
    %48 = arith.addf %42, %47 : vector<2x256xf32>
    %c64_i32 = arith.constant 64 : i32
    %49 = tpu.dynamic_rotate %48 by %c64_i32 dim 1 : vector<2x256xf32>, i32 -> vector<2x256xf32>
    %c64_i32_16 = arith.constant 64 : i32
    %50 = vector.broadcast %c64_i32_16 : i32 to vector<2x256xi32>
    %51 = arith.cmpi sge, %12, %50 : vector<2x256xi32>
    %cst_17 = arith.constant 0.000000e+00 : f32
    %52 = vector.broadcast %cst_17 : f32 to vector<2x256xf32>
    %53 = arith.select %51, %49, %52 : vector<2x256xi1>, vector<2x256xf32>
    %54 = arith.addf %48, %53 : vector<2x256xf32>
    %c128_i32 = arith.constant 128 : i32
    %55 = tpu.dynamic_rotate %54 by %c128_i32 dim 1 : vector<2x256xf32>, i32 -> vector<2x256xf32>
    %c128_i32_18 = arith.constant 128 : i32
    %56 = vector.broadcast %c128_i32_18 : i32 to vector<2x256xi32>
    %57 = arith.cmpi sge, %12, %56 : vector<2x256xi32>
    %cst_19 = arith.constant 0.000000e+00 : f32
    %58 = vector.broadcast %cst_19 : f32 to vector<2x256xf32>
    %59 = arith.select %57, %55, %58 : vector<2x256xi1>, vector<2x256xf32>
    %60 = arith.addf %54, %59 : vector<2x256xf32>
    %cst_20 = arith.constant 0.899999976 : f32
    %61 = vector.broadcast %cst_20 : f32 to vector<2x256xf32>
    %62 = arith.cmpf olt, %60, %61 : vector<2x256xf32>
    %63 = arith.extui %62 : vector<2x256xi1> to vector<2x256xi32>
    %cst_21 = arith.constant dense<0> : vector<2xi32>
    %64 = vector.multi_reduction <add>, %63, %cst_21 [1] : vector<2x256xi32> to vector<2xi32>
    %65 = vector.shape_cast %64 : vector<2xi32> to vector<2x1xi32>
    %c255_i32 = arith.constant 255 : i32
    %66 = vector.broadcast %c255_i32 : i32 to vector<2x1xi32>
    %67 = arith.minsi %65, %66 : vector<2x1xi32>
    %68 = vector.broadcast %67 : vector<2x1xi32> to vector<2x256xi32>
    %69 = arith.cmpi sle, %12, %68 : vector<2x256xi32>
    %cst_22 = arith.constant 0.000000e+00 : f32
    %70 = vector.broadcast %cst_22 : f32 to vector<2x256xf32>
    %71 = arith.select %69, %11, %70 : vector<2x256xi1>, vector<2x256xf32>
    %cst_23 = arith.constant dense<0.000000e+00> : vector<2xf32>
    %72 = vector.multi_reduction <add>, %71, %cst_23 [1] : vector<2x256xf32> to vector<2xf32>
    %73 = vector.shape_cast %72 : vector<2xf32> to vector<2x1xf32>
    %cst_24 = arith.constant 1.000000e-30 : f32
    %74 = vector.broadcast %cst_24 : f32 to vector<2x1xf32>
    %75 = arith.maximumf %73, %74 : vector<2x1xf32>
    %c0_25 = arith.constant 0 : index
    %c0_26 = arith.constant 0 : index
    %76 = vector.load %arg2[%c0_25, %c0_26] : memref<2x1xf32, #tpu.memory_space<vmem>>, vector<2x1xf32>
    %77 = arith.mulf %76, %75 : vector<2x1xf32>
    %78 = vector.broadcast %77 : vector<2x1xf32> to vector<2x256xf32>
    %79 = arith.cmpf olt, %60, %78 : vector<2x256xf32>
    %80 = arith.andi %69, %79 : vector<2x256xi1>
    %81 = arith.extui %80 : vector<2x256xi1> to vector<2x256xi32>
    %cst_27 = arith.constant dense<0> : vector<2xi32>
    %82 = vector.multi_reduction <add>, %81, %cst_27 [1] : vector<2x256xi32> to vector<2xi32>
    %83 = vector.shape_cast %82 : vector<2xi32> to vector<2x1xi32>
    %84 = arith.minsi %83, %67 : vector<2x1xi32>
    %85 = vector.broadcast %84 : vector<2x1xi32> to vector<2x256xi32>
    %86 = arith.cmpi eq, %12, %85 : vector<2x256xi32>
    %c0_i32 = arith.constant 0 : i32
    %87 = vector.broadcast %c0_i32 : i32 to vector<2x256xi32>
    %88 = arith.select %86, %1, %87 : vector<2x256xi1>, vector<2x256xi32>
    %cst_28 = arith.constant dense<0> : vector<2xi32>
    %89 = vector.multi_reduction <add>, %88, %cst_28 [1] : vector<2x256xi32> to vector<2xi32>
    %90 = vector.shape_cast %89 : vector<2xi32> to vector<2x1xi32>
    %91 = vector.broadcast %90 : vector<2x1xi32> to vector<2x256xi32>
    %92 = arith.cmpi eq, %12, %91 : vector<2x256xi32>
    %cst_29 = arith.constant 1.000000e+05 : f32
    %cst_30 = arith.constant 9.99999974E-6 : f32
    %93 = vector.broadcast %cst_29 : f32 to vector<2x256xf32>
    %94 = vector.broadcast %cst_30 : f32 to vector<2x256xf32>
    %95 = arith.select %92, %93, %94 : vector<2x256xi1>, vector<2x256xf32>
    %c0_31 = arith.constant 0 : index
    %c0_32 = arith.constant 0 : index
    %96 = vector.load %arg3[%c0_31, %c0_32] : memref<2x256xf32, #tpu.memory_space<vmem>>, vector<2x256xf32>
    tpu.vector_store %arg3[%c0_31, %c0_32], %95 {strides = array<i32>} : memref<2x256xf32, #tpu.memory_space<vmem>>, vector<2x256xf32>,
    return
  }
}

</mosaic_0001>

<bundles_post_ra>
// kernel: neg.3
= control target key start
LH: loop header
LB: loop body
LE: loop exit
PB: predicated region body
PF: predicated region fallthrough
CT: control target
= control target key end

     0   :  { %s40_s0 = inlined_call_operand.vmem [shape: f32[2,256], index: 0, kind: input, shape index: {}]   ;;  %s41_s1 = inlined_call_operand.vmem [shape: f32[2,256], index: 1, kind: output, shape index: {}]  }
   0x1   :  { %v2_v0 = vld [vmem:[%s40_s0] sm:$0x3]  ;;  %v16_v1 = vld [vmem:[%s40_s0 + $0x2] sm:$0x3] }
   0x2   :  { %v5_v2 = vxor.u32 2147483648, %v2_v0  ;;  %v12_v3 = vxor.u32 2147483648, %v16_v1 }
   0x4   :  { %7 = vst [vmem:[%s41_s1] sm:$0x3] %v5_v2 }
   0x5   :  { %17 = vst [vmem:[%s41_s1 + $0x2] sm:$0x3] %v12_v3 }

// kernel: _forward.1
= control target key start
LH: loop header
LB: loop body
LE: loop exit
PB: predicated region body
PF: predicated region fallthrough
CT: control target
= control target key end

     0   :  { %s515_s0 = inlined_call_operand.vmem [shape: f32[2,256], index: 0, kind: input, shape index: {}]   ;;  %s516_s1 = inlined_call_operand.vmem [shape: s32[2,256], index: 1, kind: input, shape index: {}]   ;;  %s517_s2 = inlined_call_operand.vmem [shape: f32[2,1], index: 2, kind: input, shape index: {}]   ;;  %s518_s3 = inlined_call_operand.hbm [shape: f32[2,256], index: 3, kind: output, shape index: {}]  }
   0x1   :  { %v15_v0 = vld [vmem:[%s515_s0] sm:$0xf] }
   0x2   :  { %18 = vst [vmem:[#allocation1] ss:$4 sm:$0xff] %v15_v0 }
   0x3   :  { %8 = vsyncpa [#allocation3], 0  ;;  %vm23_vm0 = vcmask 1041408   ;;  %v403_v6 = vmov 269488144   ;;  %s404_s0 = smov 1   ;;  %v57_v25 = vlaneseq }
   0x4   :  { %v31_v7 = vunpack.c.l.s4 %v403_v6  ;;  %s405_s14 = smov 2   ;;  %s406_s15 = smov 4  }
   0x5   :  { %v448_v27 = vand.u32 127, %v57_v25  ;;  %s407_s16 = smov 8   ;;  %s408_s17 = smov 16   ;;  %v411_v25 = vmov 0  }
   0x6   :  { %v439_v8 = vunpack.c.0.s8 %v31_v7  ;;  %s409_s18 = smov 32   ;;  %s410_s19 = smov 64   ;;  %372 = vset.pattern.permute.xlu0 %v411_v25 }
   0x7   :  { %vm70_vm1 = vcmp.lt.s32.totalorder %v448_v27, 1  ;;  %vm73_vm2 = vcmp.ge.s32.totalorder %v448_v27, 1  ;;  %vm93_vm3 = vcmp.lt.s32.totalorder %v448_v27, 2  ;;  %vm96_vm4 = vcmp.ge.s32.totalorder %v448_v27, 2  ;;  %s352_s26 = sshll.u32 %s518_s3, 4  ;;  %s353_s26 = int_to_ptr.hbm [resolvable:$true] %s352_s26 }
   0x8   :  { %vm116_vm5 = vcmp.lt.s32.totalorder %v448_v27, 4  ;;  %vm119_vm6 = vcmp.ge.s32.totalorder %v448_v27, 4  ;;  %vm139_vm7 = vcmp.lt.s32.totalorder %v448_v27, 8  ;;  %vm142_vm8 = vcmp.ge.s32.totalorder %v448_v27, 8 }
   0x9   :  { %v19_v1 = vld.sshfl [vmem:[#allocation1] sm:$0xff pattern:$0x73625140]  ;;  %v20_v2 = vld.sshfl [vmem:[#allocation1 + $0x8] sm:$0xff pattern:$0x73625140] }
   0xa   :  { %v24_v3 = vsel %vm23_vm0, %v19_v1, -inf  ;;  %v25_v4 = vsel %vm23_vm0, %v20_v2, -inf  ;;  %vm162_vm9 = vcmp.lt.s32.totalorder %v448_v27, 16  ;;  %vm165_vm10 = vcmp.ge.s32.totalorder %v448_v27, 16 }
   0xb   :  { %v26_v5 = vmax.f32 %v24_v3, %v25_v4  ;;  %vm185_vm11 = vcmp.lt.s32.totalorder %v448_v27, 32  ;;  %vm188_vm12 = vcmp.ge.s32.totalorder %v448_v27, 32  ;;  %vm208_vm13 = vcmp.lt.s32.totalorder %v448_v27, 64 }
   0xc   :  { %vm211_vm14 = vcmp.ge.s32.totalorder %v448_v27, 64 }
   0xd   :  { %27 = vmax.xlane.f32.xlu0 %v26_v5 }
  0x80   :  { %v28_v9 = vpop.xlane.xlu0 %27 }
  0x81   :  { %v33_v10 = vperm.slane %v28_v9, %v439_v8 }
  0x83   :  { %v35_v11 = vsub.f32 %v15_v0, %v33_v10 }
  0x85   :  { %v36_v12 = vmul.f32 1.442695, %v35_v11 }
  0x87   :  { %373 = vpow2.f32 %v36_v12 }
  0x8d   :  { %v374_v13 = vpop.eup %373 }
  0x8e   :  { %39 = vst [vmem:[#allocation1] ss:$4 sm:$0xff] %v374_v13 }
  0x95   :  { %v40_v14 = vld.sshfl [vmem:[#allocation1] sm:$0xff pattern:$0x73625140]  ;;  %v41_v15 = vld.sshfl [vmem:[#allocation1 + $0x8] sm:$0xff pattern:$0x73625140] }
  0x96   :  { %v44_v16 = vsel %vm23_vm0, %v40_v14, 0.0  ;;  %v45_v17 = vsel %vm23_vm0, %v41_v15, 0.0 }
  0x97   :  { %v46_v18 = vadd.f32 %v45_v17, %v44_v16 }
  0x99   :  { %47 = vadd.xlane.f32.xlu0 %v46_v18 }
 0x10c   :  { %v48_v19 = vpop.xlane.xlu0 %47 }
 0x10d   :  { %375 = vrcp.f32 %v48_v19 }
 0x113   :  { %v376_v20 = vpop.eup %375 }
 0x114   :  { %v54_v21 = vperm.slane %v376_v20, %v439_v8 }
 0x116   :  { %v445_v22 = vmul.f32 %v374_v13, %v54_v21 }
 0x118   :  { %61 = vst [vmem:[#allocation1] ss:$4 sm:$0xff] %v445_v22 }
 0x11f   :  { %v62_v23 = vld.sshfl [vmem:[#allocation1] sm:$0xff pattern:$0x73625140]  ;;  %v63_v24 = vld.sshfl [vmem:[#allocation1 + $0x8] sm:$0xff pattern:$0x73625140] }
 0x120   :  { %66 = vrot.lane.b32.xlu1 %v62_v23, %s404_s0 }
 0x128   :  { %68 = vrot.lane.b32.xlu1 %v63_v24, %s404_s0 }
 0x192   :  { %v67_v26 = vpop.permute.xlu1 %66 }
 0x19a   :  { %v69_v28 = vpop.permute.xlu1 %68 }
 0x19b   :  { %v71_v29 = vsel %vm70_vm1, %v67_v26, %v69_v28  ;;  %v72_v30 = vsel %vm70_vm1, %v69_v28, %v67_v26 }
 0x19c   :  { %v75_v31 = vsel %vm73_vm2, %v72_v30, 0.0  ;;  %v79_v32 = vrot.slane %v71_v29, 6 }
 0x19e   :  { %v80_v33 = vsel %vm23_vm0, %v75_v31, %v79_v32 }
 0x19f   :  { %v82_v34 = vadd.f32 %v80_v33, %v445_v22 }
 0x1a1   :  { %84 = vst [vmem:[#allocation1] ss:$4 sm:$0xff] %v82_v34 }
 0x1a8   :  { %v85_v35 = vld.sshfl [vmem:[#allocation1] sm:$0xff pattern:$0x73625140]  ;;  %v86_v36 = vld.sshfl [vmem:[#allocation1 + $0x8] sm:$0xff pattern:$0x73625140] }
 0x1a9   :  { %89 = vrot.lane.b32.xlu2 %v85_v35, %s405_s14 }
 0x1b1   :  { %91 = vrot.lane.b32.xlu2 %v86_v36, %s405_s14 }
 0x203   :  { %v90_v37 = vpop.permute.xlu2 %89 }
 0x20b   :  { %v92_v38 = vpop.permute.xlu2 %91 }
 0x20c   :  { %v94_v39 = vsel %vm93_vm3, %v90_v37, %v92_v38  ;;  %v95_v40 = vsel %vm93_vm3, %v92_v38, %v90_v37 }
 0x20d   :  { %v98_v41 = vsel %vm96_vm4, %v95_v40, 0.0  ;;  %v102_v42 = vrot.slane %v94_v39, 6 }
 0x20f   :  { %v103_v43 = vsel %vm23_vm0, %v98_v41, %v102_v42 }
 0x210   :  { %v105_v44 = vadd.f32 %v103_v43, %v82_v34 }
 0x212   :  { %107 = vst [vmem:[#allocation1] ss:$4 sm:$0xff] %v105_v44 }
 0x219   :  { %v109_v45 = vld.sshfl [vmem:[#allocation1 + $0x8] sm:$0xff pattern:$0x73625140]  ;;  %v108_v46 = vld.sshfl [vmem:[#allocation1] sm:$0xff pattern:$0x73625140] }
 0x21a   :  { %114 = vrot.lane.b32.xlu1 %v109_v45, %s406_s15  ;;  %112 = vrot.lane.b32.xlu0 %v108_v46, %s406_s15 }
 0x28c   :  { %v115_v47 = vpop.permute.xlu1 %114  ;;  %v113_v48 = vpop.permute.xlu0 %112 }
 0x28d   :  { %v117_v49 = vsel %vm116_vm5, %v113_v48, %v115_v47  ;;  %v118_v50 = vsel %vm116_vm5, %v115_v47, %v113_v48 }
 0x28e   :  { %v121_v51 = vsel %vm119_vm6, %v118_v50, 0.0  ;;  %v125_v52 = vrot.slane %v117_v49, 6 }
 0x290   :  { %v126_v53 = vsel %vm23_vm0, %v121_v51, %v125_v52 }
 0x291   :  { %v128_v54 = vadd.f32 %v126_v53, %v105_v44 }
 0x293   :  { %130 = vst [vmem:[#allocation1] ss:$4 sm:$0xff] %v128_v54 }
 0x29a   :  { %v132_v55 = vld.sshfl [vmem:[#allocation1 + $0x8] sm:$0xff pattern:$0x73625140]  ;;  %v131_v56 = vld.sshfl [vmem:[#allocation1] sm:$0xff pattern:$0x73625140] }
 0x29b   :  { %137 = vrot.lane.b32.xlu1 %v132_v55, %s407_s16  ;;  %135 = vrot.lane.b32.xlu2 %v131_v56, %s407_s16  ;;  %v479_v55 = vadd.s32 128, %v448_v27 }
 0x2f5   :  { %v136_v57 = vpop.permute.xlu2 %135 }
 0x30d   :  { %v138_v58 = vpop.permute.xlu1 %137 }
 0x30e   :  { %v140_v59 = vsel %vm139_vm7, %v136_v57, %v138_v58  ;;  %v141_v60 = vsel %vm139_vm7, %v138_v58, %v136_v57 }
 0x30f   :  { %v144_v61 = vsel %vm142_vm8, %v141_v60, 0.0  ;;  %v148_v62 = vrot.slane %v140_v59, 6 }
 0x311   :  { %v149_v63 = vsel %vm23_vm0, %v144_v61, %v148_v62 }
 0x312   :  { %v151_v0 = vadd.f32 %v149_v63, %v128_v54  ;;  %v274_v63 = vld [vmem:[%s517_s2] sm:$0x3] }
 0x314   :  { %153 = vst [vmem:[#allocation1] ss:$4 sm:$0xff] %v151_v0 }
 0x31b   :  { %v155_v1 = vld.sshfl [vmem:[#allocation1 + $0x8] sm:$0xff pattern:$0x73625140]  ;;  %v154_v2 = vld.sshfl [vmem:[#allocation1] sm:$0xff pattern:$0x73625140] }
 0x31c   :  { %160 = vrot.lane.b32.xlu1 %v155_v1, %s408_s17  ;;  %158 = vrot.lane.b32.xlu2 %v154_v2, %s408_s17 }
 0x376   :  { %v159_v3 = vpop.permute.xlu2 %158 }
 0x38e   :  { %v161_v4 = vpop.permute.xlu1 %160 }
 0x38f   :  { %v163_v5 = vsel %vm162_vm9, %v159_v3, %v161_v4  ;;  %v164_v6 = vsel %vm162_vm9, %v161_v4, %v159_v3 }
 0x390   :  { %v167_v7 = vsel %vm165_vm10, %v164_v6, 0.0  ;;  %v171_v9 = vrot.slane %v163_v5, 6 }
 0x392   :  { %v172_v10 = vsel %vm23_vm0, %v167_v7, %v171_v9 }
 0x393   :  { %v174_v11 = vadd.f32 %v172_v10, %v151_v0 }
 0x395   :  { %176 = vst [vmem:[#allocation1] ss:$4 sm:$0xff] %v174_v11 }
 0x39c   :  { %v178_v12 = vld.sshfl [vmem:[#allocation1 + $0x8] sm:$0xff pattern:$0x73625140]  ;;  %v177_v13 = vld.sshfl [vmem:[#allocation1] sm:$0xff pattern:$0x73625140] }
 0x39d   :  { %183 = vrot.lane.b32.xlu0 %v178_v12, %s409_s18  ;;  %181 = vrot.lane.b32.xlu2 %v177_v13, %s409_s18 }
 0x3f7   :  { %v182_v14 = vpop.permute.xlu2 %181 }
 0x40f   :  { %v184_v15 = vpop.permute.xlu0 %183 }
 0x410   :  { %v186_v16 = vsel %vm185_vm11, %v182_v14, %v184_v15  ;;  %v187_v17 = vsel %vm185_vm11, %v184_v15, %v182_v14 }
 0x411   :  { %v190_v18 = vsel %vm188_vm12, %v187_v17, 0.0  ;;  %v194_v19 = vrot.slane %v186_v16, 6  ;;  %v16_v17 = vld [vmem:[%s516_s1] sm:$0xf]  ;;  %s412_s1 = smov [#allocation2]  }
 0x412   :  { %s350_s23 = sshll.u32 %s412_s1, 4  ;;  %s351_s23 = int_to_ptr.vmem [resolvable:$true] %s350_s23 }
 0x413   :  { %v195_v20 = vsel %vm23_vm0, %v190_v18, %v194_v19 }
 0x414   :  { %v197_v21 = vadd.f32 %v195_v20, %v174_v11 }
 0x416   :  { %199 = vst [vmem:[#allocation1] ss:$4 sm:$0xff] %v197_v21 }
 0x41d   :  { %v201_v23 = vld.sshfl [vmem:[#allocation1 + $0x8] sm:$0xff pattern:$0x73625140]  ;;  %v200_v24 = vld.sshfl [vmem:[#allocation1] sm:$0xff pattern:$0x73625140] }
 0x41e   :  { %206 = vrot.lane.b32.xlu2 %v201_v23, %s410_s19  ;;  %204 = vrot.lane.b32.xlu1 %v200_v24, %s410_s19 }
 0x478   :  { %v207_v26 = vpop.permute.xlu2 %206 }
 0x490   :  { %v205_v28 = vpop.permute.xlu1 %204 }
 0x491   :  { %v209_v29 = vsel %vm208_vm13, %v205_v28, %v207_v26  ;;  %v210_v30 = vsel %vm208_vm13, %v207_v26, %v205_v28 }
 0x492   :  { %v213_v31 = vsel %vm211_vm14, %v210_v30, 0.0  ;;  %v217_v32 = vrot.slane %v209_v29, 6 }
 0x494   :  { %v218_v33 = vsel %vm23_vm0, %v213_v31, %v217_v32 }
 0x495   :  { %v220_v34 = vadd.f32 %v218_v33, %v197_v21 }
 0x497   :  { %222 = vst [vmem:[#allocation1] ss:$4 sm:$0xff] %v220_v34 }
 0x49e   :  { %v223_v35 = vld.sshfl [vmem:[#allocation1] sm:$0xff pattern:$0x73625140] }
 0x49f   :  { %v233_v36 = vrot.slane %v223_v35, 6 }
 0x4a1   :  { %v234_v37 = vsel %vm23_vm0, 0.0, %v233_v36 }
 0x4a2   :  { %v236_v38 = vadd.f32 %v234_v37, %v220_v34 }
 0x4a4   :  { %vm237_vm15 = vcmp.lt.f32.partialorder %v236_v38, 0.9 }
 0x4a5   :  { %v238_v39 = vsel %vm237_vm15, 1, %v411_v25 }
 0x4a6   :  { %239 = vst [vmem:[#allocation1] ss:$4 sm:$0xff] %v238_v39 }
 0x4ad   :  { %v240_v40 = vld.sshfl [vmem:[#allocation1] sm:$0xff pattern:$0x73625140]  ;;  %v241_v41 = vld.sshfl [vmem:[#allocation1 + $0x8] sm:$0xff pattern:$0x73625140] }
 0x4ae   :  { %v242_v42 = vsel %vm23_vm0, %v240_v40, 0  ;;  %v243_v43 = vsel %vm23_vm0, %v241_v41, 0  ;;  %261 = vst [vmem:[#allocation1] ss:$4 sm:$0xff] %v445_v22 }
 0x4af   :  { %v244_v44 = vadd.s32 %v243_v43, %v242_v42 }
 0x4b1   :  { %v246_v45 = vshrl.u32 %v244_v44, 16  ;;  %v245_v46 = vand.u32 65535, %v244_v44  ;;  %v413_v44 = vmov 1e-05  }
 0x4b3   :  { %v248_v47 = vcvt.s32.f32 %v246_v45  ;;  %v247_v48 = vcvt.s32.f32 %v245_v46 }
 0x4b5   :  { %251 = vadd.xlane.f32.xlu0 %v248_v47  ;;  %249 = vadd.xlane.f32.xlu1 %v247_v48  ;;  %v262_v22 = vld.sshfl [vmem:[#allocation1] sm:$0xff pattern:$0x73625140]  ;;  %v263_v57 = vld.sshfl [vmem:[#allocation1 + $0x8] sm:$0xff pattern:$0x73625140] }
 0x528   :  { %v252_v49 = vpop.xlane.xlu0 %251  ;;  %v250_v50 = vpop.xlane.xlu1 %249 }
 0x529   :  { %v254_v51 = vcvt.f32.s32 %v252_v49  ;;  %v253_v53 = vcvt.f32.s32 %v250_v50 }
 0x52b   :  { %v255_v52 = vshll.u32 %v254_v51, 16 }
 0x52d   :  { %v256_v54 = vadd.s32 %v255_v52, %v253_v53 }
 0x52f   :  { %vm257_vm1 = vcmp.lt.s32.totalorder %v256_v54, 255 }
 0x530   :  { %v258_v56 = vsel %vm257_vm1, %v256_v54, 255 }
 0x531   :  { %vm259_vm2 = vcmp.le.s32.totalorder %v448_v27, %v258_v56  ;;  %vm260_vm3 = vcmp.le.s32.totalorder %v479_v55, %v258_v56 }
 0x532   :  { %v266_v58 = vsel %vm259_vm2, %v262_v22, 0.0  ;;  %v267_v59 = vsel %vm260_vm3, %v263_v57, 0.0 }
 0x533   :  { %v268_v60 = vsel %vm23_vm0, %v266_v58, 0.0  ;;  %v269_v61 = vsel %vm23_vm0, %v267_v59, 0.0 }
 0x534   :  { %v270_v62 = vadd.f32 %v269_v61, %v268_v60 }
 0x536   :  { %271 = vadd.xlane.f32.xlu2 %v270_v62 }
 0x5a9   :  { %v272_v0 = vpop.xlane.xlu2 %271 }
 0x5aa   :  { %v273_v1 = vmax.f32 %v272_v0, 1e-30 }
 0x5ac   :  { %v275_v2 = vmul.f32 %v274_v63, %v273_v1 }
 0x5ae   :  { %278 = vperm.xlu0 %372, %v275_v2  }
 0x620   :  { %v279_v3 = vpop.permute.xlu0 %278 }
 0x621   :  { %v283_v4 = vperm.slane %v279_v3, %v439_v8 }
 0x623   :  { %vm285_vm4 = vcmp.lt.f32.partialorder %v236_v38, %v283_v4 }
 0x624   :  { %v286_v5 = vsel %vm285_vm4, 1, %v411_v25 }
 0x625   :  { %287 = vst [vmem:[#allocation1] ss:$4 sm:$0xff] %v286_v5 }
 0x62c   :  { %v288_v6 = vld.sshfl [vmem:[#allocation1] sm:$0xff pattern:$0x73625140]  ;;  %v289_v7 = vld.sshfl [vmem:[#allocation1 + $0x8] sm:$0xff pattern:$0x73625140] }
 0x62d   :  { %vm290_vm5 = vcmp.ne.s32.totalorder %v288_v6, 0  ;;  %vm291_vm6 = vcmp.ne.s32.totalorder %v289_v7, 0  ;;  %315 = vst [vmem:[#allocation1] ss:$4 sm:$0xff] %v16_v17 }
 0x62e   :  { %vm292_vm7 = vmand %vm259_vm2, %vm290_vm5 }
 0x62f   :  { %vm293_vm8 = vmand %vm260_vm3, %vm291_vm6  ;;  %v294_v9 = vsel %vm292_vm7, 1, %v411_v25 }
 0x630   :  { %v295_v10 = vsel %vm293_vm8, 1, %v411_v25  ;;  %v296_v8 = vsel %vm23_vm0, %v294_v9, 0 }
 0x631   :  { %v297_v11 = vsel %vm23_vm0, %v295_v10, 0 }
 0x632   :  { %v298_v12 = vadd.s32 %v297_v11, %v296_v8 }
 0x634   :  { %v300_v13 = vshrl.u32 %v298_v12, 16  ;;  %v299_v14 = vand.u32 65535, %v298_v12  ;;  %v316_v25 = vld.sshfl [vmem:[#allocation1] sm:$0xff pattern:$0x73625140] }
 0x635   :  { %v317_v26 = vld.sshfl [vmem:[#allocation1 + $0x8] sm:$0xff pattern:$0x73625140] }
 0x636   :  { %v302_v15 = vcvt.s32.f32 %v300_v13  ;;  %v301_v16 = vcvt.s32.f32 %v299_v14 }
 0x638   :  { %305 = vadd.xlane.f32.xlu2 %v302_v15  ;;  %303 = vadd.xlane.f32.xlu1 %v301_v16 }
 0x6ab   :  { %v306_v18 = vpop.xlane.xlu2 %305  ;;  %v304_v19 = vpop.xlane.xlu1 %303 }
 0x6ac   :  { %v308_v20 = vcvt.f32.s32 %v306_v18  ;;  %v307_v23 = vcvt.f32.s32 %v304_v19 }
 0x6ae   :  { %v309_v21 = vshll.u32 %v308_v20, 16 }
 0x6b0   :  { %v310_v24 = vadd.s32 %v309_v21, %v307_v23 }
 0x6b2   :  { %vm311_vm9 = vcmp.lt.s32.totalorder %v310_v24, %v258_v56 }
 0x6b3   :  { %v312_v28 = vsel %vm311_vm9, %v310_v24, %v258_v56 }
 0x6b4   :  { %vm313_vm10 = vcmp.eq.s32.totalorder %v448_v27, %v312_v28  ;;  %vm314_vm11 = vcmp.eq.s32.totalorder %v479_v55, %v312_v28 }
 0x6b5   :  { %v318_v29 = vsel %vm313_vm10, %v316_v25, 0  ;;  %v319_v30 = vsel %vm314_vm11, %v317_v26, 0 }
 0x6b6   :  { %v320_v31 = vsel %vm23_vm0, %v318_v29, 0  ;;  %v321_v32 = vsel %vm23_vm0, %v319_v30, 0 }
 0x6b7   :  { %v322_v33 = vadd.s32 %v321_v32, %v320_v31 }
 0x6b9   :  { %v324_v34 = vshrl.u32 %v322_v33, 16  ;;  %v323_v35 = vand.u32 65535, %v322_v33 }
 0x6bb   :  { %v326_v36 = vcvt.s32.f32 %v324_v34  ;;  %v325_v37 = vcvt.s32.f32 %v323_v35 }
 0x6bd   :  { %329 = vadd.xlane.f32.xlu2 %v326_v36  ;;  %327 = vadd.xlane.f32.xlu1 %v325_v37 }
 0x730   :  { %v330_v38 = vpop.xlane.xlu2 %329  ;;  %v328_v39 = vpop.xlane.xlu1 %327 }
 0x731   :  { %v332_v40 = vcvt.f32.s32 %v330_v38  ;;  %v331_v42 = vcvt.f32.s32 %v328_v39 }
 0x733   :  { %v333_v41 = vshll.u32 %v332_v40, 16 }
 0x735   :  { %v334_v43 = vadd.s32 %v333_v41, %v331_v42 }
 0x737   :  { %vm335_vm12 = vcmp.eq.s32.totalorder %v448_v27, %v334_v43  ;;  %vm336_vm13 = vcmp.eq.s32.totalorder %v479_v55, %v334_v43 }
 0x738   :  { %v338_v45 = vsel %vm336_vm13, 100000.0, %v413_v44  ;;  %v337_v47 = vsel %vm335_vm12, 100000.0, %v413_v44 }
 0x739   :  { %v341_v46 = vrot.slane %v338_v45, 6 }
 0x73b   :  { %v342_v48 = vsel %vm23_vm0, %v337_v47, %v341_v46 }
 0x73c   :  { %344 = vst [vmem:[#allocation2] sm:$0xf] %v342_v48 }
 0x73d   :  { %355 = dma.vmem_to_hbm [thread:$0]  %s351_s23, 64, %s353_s26, [#allocation3]  }
 0x73e   :  { %401 = dma.done.wait [#allocation3], 64  }
 0x73f   :  { %402 = vsyncadd [#allocation3], 4294967232 }
 0x740   :  { %360 = vsyncpa [#allocation3], 1 }

</bundles_post_ra>
